<compile_context>
chip_gen: v7x
topology: tpu7x:2x2x1
jax: 0.10.0
libtpu: 0.0.40
codegen_flags: <defaults>
</compile_context>

<pallas_src>
import functools

import jax
import jax.numpy as jnp
from jax.experimental import pallas as pl
from jax.experimental.pallas import tpu as pltpu


def _fused_coupling_kernel(x_ref, w1_ref, b1_ref, w2_ref, b2_ref, out_ref):
    """out = x + relu(x @ W1f + b1) @ W2f + b2f for one lane-dense batch tile.

    W1f / W2f / b2f are the layer weights pre-scattered into the interleaved
    column layout (zero rows/cols for the pass-through partition), so this one
    expression implements split -> MLP -> additive coupling -> interleave.
    """
    x = x_ref[...]                                                  # (TB, D) f32
    h = jnp.dot(x, w1_ref[...], preferred_element_type=jnp.float32)
    h = jnp.maximum(h + b1_ref[...], 0.0)                           # (TB, H)
    upd = jnp.dot(h, w2_ref[...], preferred_element_type=jnp.float32)
    out_ref[...] = x + upd + b2_ref[...]                            # (TB, D)


def _pick_batch_tile(batch, dim, hidden, vmem_budget_bytes=16 * 1024 * 1024,
                     target_steps=4, min_rows=512):
    """Batch tile: big enough for HBM roofline, small enough for >=4 pipeline steps."""
    itemsize = 4  # f32
    # Weights/biases are grid-invariant; budget 2x (double-buffer) to be safe.
    weight_bytes = 2 * itemsize * (dim * hidden + hidden + hidden * dim + dim)
    # Streamed per batch row: x in + out, each double-buffered by the pipeline.
    per_row_bytes = 2 * itemsize * 2 * dim
    tb = (vmem_budget_bytes - weight_bytes) // per_row_bytes
    tb = int(max(8, min(tb, 2048)))
    padded_batch = max(8, ((batch + 7) // 8) * 8)
    tb = min(tb, padded_batch)
    # Prefer >= target_steps grid steps (DMA/compute overlap; balanced split
    # across v7x's two TensorCores) as long as tiles stay >= min_rows.
    if padded_batch >= target_steps * min_rows:
        per_step = -(-padded_batch // target_steps)       # ceil
        per_step = ((per_step + 7) // 8) * 8
        tb = min(tb, per_step)
    return max(8, (tb // 8) * 8)                          # sublane (8) aligned


@functools.partial(jax.jit, static_argnames=('partition', 'block_rows'))
def coupling_layer_forward(x, params, partition='even', block_rows=None):
    """Forward pass of the (additive) coupling layer.

    Args:
      x: (B, dim) float32 array, dim must be even.
      params: dict with 'w1' (D/2,H), 'b1' (1,H), 'w2' (H,D/2), 'b2' (1,D/2).
      partition: 'even' or 'odd'.
      block_rows: optional batch-tile override (testing / tuning).
    Returns:
      (B, dim) float32 array.
    """
    B, dim = x.shape
    assert dim % 2 == 0  # TODO(synk): odd `dim` (ragged interleave) not handled
    w1, b1, w2, b2 = params['w1'], params['b1'], params['w2'], params['b2']
    hidden = w1.shape[1]

    p_first = 0 if partition == 'even' else 1
    p_second = 1 - p_first

    # Fold the even/odd split and final interleave into the weights:
    #   W1f rows at `first` columns, W2f/b2f columns at `second` columns,
    #   zeros elsewhere (pass-through columns become identity).
    # Weight-sized, one-time cost; in a multi-layer flow precompute these once.
    w1_full = jnp.zeros((dim, hidden), jnp.float32).at[p_first::2, :].set(w1)
    w2_full = jnp.zeros((hidden, dim), jnp.float32).at[:, p_second::2].set(w2)
    b2_full = jnp.zeros((1, dim), jnp.float32).at[:, p_second::2].set(b2)

    tb = int(block_rows) if block_rows is not None else _pick_batch_tile(B, dim, hidden)
    grid = (pl.cdiv(B, tb),)
    row_spec = pl.BlockSpec((tb, dim), lambda i: (i, 0))

    cost = pl.CostEstimate(
        flops=4 * B * dim * hidden + 2 * B * dim,
        transcendentals=0,
        bytes_accessed=2 * B * dim * 4 + (2 * dim * hidden + hidden + dim) * 4,
    )

    out = pl.pallas_call(
        _fused_coupling_kernel,
        out_shape=jax.ShapeDtypeStruct((B, dim), jnp.float32),
        grid_spec=pltpu.PrefetchScalarGridSpec(
            num_scalar_prefetch=0,
            grid=grid,
            in_specs=[
                row_spec,                                         # x tile (lane-dense)
                pl.BlockSpec((dim, hidden), lambda i: (0, 0)),    # W1f (VMEM-resident)
                pl.BlockSpec((1, hidden), lambda i: (0, 0)),      # b1  (resident)
                pl.BlockSpec((hidden, dim), lambda i: (0, 0)),    # W2f (resident)
                pl.BlockSpec((1, dim), lambda i: (0, 0)),         # b2f (resident)
            ],
            out_specs=row_spec,                                   # interleaved, lane-dense
        ),
        cost_estimate=cost,
        compiler_params=pltpu.CompilerParams(
            dimension_semantics=("parallel",),    # batch tiles -> both TCs on v7x
            vmem_limit_bytes=32 * 1024 * 1024,    # 2x headroom over 16 MiB budget
        ),
    )(x, w1_full, b1, w2_full, b2_full)
    return out


def _reference_forward(x, params, partition):
    """Pure-JAX reference reproducing the PyTorch semantics (additive law)."""
    even_cols = x[:, 0::2]
    odd_cols = x[:, 1::2]
    first, second = (even_cols, odd_cols) if partition == 'even' else (odd_cols, even_cols)
    h = jnp.maximum(first @ params['w1'] + params['b1'], 0.0)
    nl = h @ params['w2'] + params['b2']
    coupled = second + nl
    if partition == 'even':
        return jnp.stack([first, coupled], axis=-1).reshape(x.shape)
    return jnp.stack([coupled, first], axis=-1).reshape(x.shape)


if __name__ == "__main__":
    DIM, HIDDEN = 256, 32
    HALF = DIM // 2

    key = jax.random.PRNGKey(0)
    kx, kx2, kw1, kb1, kw2, kb2 = jax.random.split(key, 6)

    params = {
        'w1': jax.random.normal(kw1, (HALF, HIDDEN), dtype=jnp.float32) * 0.05,
        'b1': jax.random.normal(kb1, (1, HIDDEN), dtype=jnp.float32) * 0.01,
        'w2': jax.random.normal(kw2, (HIDDEN, HALF), dtype=jnp.float32) * 0.05,
        'b2': jax.random.normal(kb2, (1, HALF), dtype=jnp.float32) * 0.01,
    }

    # Small single-tile case (B=8).
    x = jax.random.normal(kx, (8, DIM), dtype=jnp.float32)
    for part in ('even', 'odd'):
        out = jax.block_until_ready(coupling_layer_forward(x, params, partition=part))
        ref = _reference_forward(x, params, part)
        assert out.shape == x.shape
        assert jnp.allclose(out, ref, atol=1e-5, rtol=1e-5), f"mismatch ({part})"

    # Multi-tile grid with a partial last tile (B=20, block_rows=8 -> 3 steps).
    x2 = jax.random.normal(kx2, (20, DIM), dtype=jnp.float32)
    out2 = jax.block_until_ready(
        coupling_layer_forward(x2, params, partition='even', block_rows=8))
    ref2 = _reference_forward(x2, params, 'even')
    assert jnp.allclose(out2, ref2, atol=1e-5, rtol=1e-5), "mismatch (multi-tile)"

    print("KERNEL_OK")
</pallas_src>

<mosaic_0001>
module attributes {stable_mosaic.version = 11 : i64} {
  func.func @_fused_coupling_kernel(%arg0: i32, %arg1: memref<8x256xf32, #tpu.memory_space<vmem>>, %arg2: memref<256x32xf32, #tpu.memory_space<vmem>>, %arg3: memref<1x32xf32, #tpu.memory_space<vmem>>, %arg4: memref<32x256xf32, #tpu.memory_space<vmem>>, %arg5: memref<1x256xf32, #tpu.memory_space<vmem>>, %arg6: memref<8x256xf32, #tpu.memory_space<vmem>>) attributes {dimension_semantics = [#tpu.dimension_semantics<parallel>], iteration_bounds = array<i64: 1>, scalar_prefetch = 0 : i64, scratch_operands = 0 : i64, tpu.core_type = #tpu.core_type<tc>, window_params = [{transform_indices = @transform_0, window_bounds = array<i64: 8, 256>}, {pipeline_mode = #tpu.pipeline_mode<synchronous>, transform_indices = @transform_1, window_bounds = array<i64: 256, 32>}, {pipeline_mode = #tpu.pipeline_mode<synchronous>, transform_indices = @transform_2, window_bounds = array<i64: 1, 32>}, {pipeline_mode = #tpu.pipeline_mode<synchronous>, transform_indices = @transform_3, window_bounds = array<i64: 32, 256>}, {pipeline_mode = #tpu.pipeline_mode<synchronous>, transform_indices = @transform_4, window_bounds = array<i64: 1, 256>}, {transform_indices = @transform_5, window_bounds = array<i64: 8, 256>}]} {
    %c0 = arith.constant 0 : index
    %c0_0 = arith.constant 0 : index
    %0 = vector.load %arg1[%c0, %c0_0] : memref<8x256xf32, #tpu.memory_space<vmem>>, vector<8x256xf32>
    %c0_1 = arith.constant 0 : index
    %c0_2 = arith.constant 0 : index
    %1 = vector.load %arg2[%c0_1, %c0_2] : memref<256x32xf32, #tpu.memory_space<vmem>>, vector<256x32xf32>
    %cst = arith.constant dense<0.000000e+00> : vector<8x32xf32>
    %2 = tpu.matmul %0, %1, %cst {dimension_numbers = #tpu.dot_dimension_numbers<[1], [0], [0], [1], [0, 0, 1, 1], [], []>} : vector<8x256xf32>, vector<256x32xf32>, vector<8x32xf32> -> vector<8x32xf32>
    %c0_3 = arith.constant 0 : index
    %c0_4 = arith.constant 0 : index
    %3 = vector.load %arg3[%c0_3, %c0_4] : memref<1x32xf32, #tpu.memory_space<vmem>>, vector<1x32xf32>
    %4 = vector.broadcast %3 : vector<1x32xf32> to vector<8x32xf32>
    %5 = arith.addf %2, %4 : vector<8x32xf32>
    %cst_5 = arith.constant 0.000000e+00 : f32
    %6 = vector.broadcast %cst_5 : f32 to vector<8x32xf32>
    %7 = arith.maximumf %5, %6 : vector<8x32xf32>
    %c0_6 = arith.constant 0 : index
    %c0_7 = arith.constant 0 : index
    %8 = vector.load %arg4[%c0_6, %c0_7] : memref<32x256xf32, #tpu.memory_space<vmem>>, vector<32x256xf32>
    %cst_8 = arith.constant dense<0.000000e+00> : vector<8x256xf32>
    %9 = tpu.matmul %7, %8, %cst_8 {dimension_numbers = #tpu.dot_dimension_numbers<[1], [0], [0], [1], [0, 0, 1, 1], [], []>} : vector<8x32xf32>, vector<32x256xf32>, vector<8x256xf32> -> vector<8x256xf32>
    %10 = arith.addf %0, %9 : vector<8x256xf32>
    %c0_9 = arith.constant 0 : index
    %c0_10 = arith.constant 0 : index
    %11 = vector.load %arg5[%c0_9, %c0_10] : memref<1x256xf32, #tpu.memory_space<vmem>>, vector<1x256xf32>
    %12 = vector.broadcast %11 : vector<1x256xf32> to vector<8x256xf32>
    %13 = arith.addf %10, %12 : vector<8x256xf32>
    %c0_11 = arith.constant 0 : index
    %c0_12 = arith.constant 0 : index
    %14 = vector.load %arg6[%c0_11, %c0_12] : memref<8x256xf32, #tpu.memory_space<vmem>>, vector<8x256xf32>
    tpu.vector_store %arg6[%c0_11, %c0_12], %13 {strides = array<i32>} : memref<8x256xf32, #tpu.memory_space<vmem>>, vector<8x256xf32>,
    return
  }
  func.func @transform_0(%arg0: i32) -> (i32, i32) {
    %c0_i32 = arith.constant 0 : i32
    %c0_i32_0 = arith.constant 0 : i32
    return %arg0, %c0_i32 : i32, i32
  }
  func.func @transform_1(%arg0: i32) -> (i32, i32) {
    %c0_i32 = arith.constant 0 : i32
    %c0_i32_0 = arith.constant 0 : i32
    %c0_i32_1 = arith.constant 0 : i32
    return %c0_i32, %c0_i32_0 : i32, i32
  }
  func.func @transform_2(%arg0: i32) -> (i32, i32) {
    %c0_i32 = arith.constant 0 : i32
    %c0_i32_0 = arith.constant 0 : i32
    %c0_i32_1 = arith.constant 0 : i32
    return %c0_i32, %c0_i32_0 : i32, i32
  }
  func.func @transform_3(%arg0: i32) -> (i32, i32) {
    %c0_i32 = arith.constant 0 : i32
    %c0_i32_0 = arith.constant 0 : i32
    %c0_i32_1 = arith.constant 0 : i32
    return %c0_i32, %c0_i32_0 : i32, i32
  }
  func.func @transform_4(%arg0: i32) -> (i32, i32) {
    %c0_i32 = arith.constant 0 : i32
    %c0_i32_0 = arith.constant 0 : i32
    %c0_i32_1 = arith.constant 0 : i32
    return %c0_i32, %c0_i32_0 : i32, i32
  }
  func.func @transform_5(%arg0: i32) -> (i32, i32) {
    %c0_i32 = arith.constant 0 : i32
    %c0_i32_0 = arith.constant 0 : i32
    return %arg0, %c0_i32 : i32, i32
  }
}

</mosaic_0001>

<bundles_post_ra>
// kernel: coupling_layer_forward.1
= control target key start
LH: loop header
LB: loop body
LE: loop exit
PB: predicated region body
PF: predicated region fallthrough
CT: control target
= control target key end

     0   :  { %s531_s0 = inlined_call_operand.vmem [shape: f32[8,256], index: 0, kind: input, shape index: {}]   ;;  %s532_s1 = inlined_call_operand.vmem [shape: f32[256,32], index: 1, kind: input, shape index: {}]   ;;  %s533_s2 = inlined_call_operand.vmem [shape: f32[1,32], index: 2, kind: input, shape index: {}]   ;;  %s534_s3 = inlined_call_operand.vmem [shape: f32[32,256], index: 3, kind: input, shape index: {}]   ;;  %s535_s4 = inlined_call_operand.vmem [shape: f32[1,256], index: 4, kind: input, shape index: {}]   ;;  %s536_s5 = inlined_call_operand.hbm [shape: f32[8,256], index: 5, kind: output, shape index: {}]  }
   0x1   :  { %v39_v0 = vld [vmem:[%s532_s1 + $0x80] sm:$0xff]  ;;  %v40_v1 = vld [vmem:[%s532_s1 + $0x88] sm:$0xff]  ;;  %v41_v5 = vld [vmem:[%s532_s1 + $0x90] sm:$0xff] }
   0x2   :  { %v23_v2 = vld [vmem:[%s532_s1] sm:$0xff]  ;;  %v285_v3 = vpack.c.bf16 %v40_v1, %v39_v0  ;;  %v24_v4 = vld [vmem:[%s532_s1 + $0x8] sm:$0xff]  ;;  %v42_v6 = vld [vmem:[%s532_s1 + $0x98] sm:$0xff] }
   0x3   :  { %v287_v7 = vpack.c.bf16 %v24_v4, %v23_v2  ;;  %v289_v8 = vpack.c.bf16 %v42_v6, %v41_v5  ;;  %v25_v9 = vld [vmem:[%s532_s1 + $0x10] sm:$0xff]  ;;  %v26_v10 = vld [vmem:[%s532_s1 + $0x18] sm:$0xff]  ;;  %v43_v11 = vld [vmem:[%s532_s1 + $0xa0] sm:$0xff] }
   0x4   :  { %286 = vmatprep.subr.bf16.mxu0 %v285_v3  ;;  %v44_v12 = vld [vmem:[%s532_s1 + $0xa8] sm:$0xff]  ;;  %v291_v13 = vpack.c.bf16 %v26_v10, %v25_v9  ;;  %v27_v15 = vld [vmem:[%s532_s1 + $0x20] sm:$0xff]  ;;  %v45_v17 = vld [vmem:[%s532_s1 + $0xb0] sm:$0xff] }
   0x5   :  { %288 = vmatpush3.bf16.msra.mxu0 %v287_v7  ;;  %v293_v14 = vpack.c.bf16 %v44_v12, %v43_v11  ;;  %v28_v16 = vld [vmem:[%s532_s1 + $0x28] sm:$0xff]  ;;  %v46_v18 = vld [vmem:[%s532_s1 + $0xb8] sm:$0xff]  ;;  %v29_v21 = vld [vmem:[%s532_s1 + $0x30] sm:$0xff] }
   0x6   :  { %290 = vmatprep.subr.bf16.mxu0 %v289_v8  ;;  %v295_v19 = vpack.c.bf16 %v28_v16, %v27_v15  ;;  %v297_v20 = vpack.c.bf16 %v46_v18, %v45_v17  ;;  %v30_v22 = vld [vmem:[%s532_s1 + $0x38] sm:$0xff]  ;;  %v47_v23 = vld [vmem:[%s532_s1 + $0xc0] sm:$0xff]  ;;  %v48_v24 = vld [vmem:[%s532_s1 + $0xc8] sm:$0xff] }
   0x7   :  { %v440_v25 = vld [vmem:[%s531_s0 + $0x8] sm:$0xff] }
   0x8   :  { %126 = vmatprep.mubr.f32.mxu0 %v440_v25 }
   0x9   :  { %292 = vmatpush3.bf16.msra.mxu0 %v291_v13 }
   0xa   :  { %294 = vmatprep.subr.bf16.mxu0 %v293_v14 }
   0xb   :  { %10 = vsyncpa [#allocation3], 0  ;;  %v299_v26 = vpack.c.bf16 %v30_v22, %v29_v21  ;;  %v301_v27 = vpack.c.bf16 %v48_v24, %v47_v23  ;;  %v31_v28 = vld [vmem:[%s532_s1 + $0x40] sm:$0xff]  ;;  %v32_v29 = vld [vmem:[%s532_s1 + $0x48] sm:$0xff]  ;;  %v351_v62 = vmov 0.0   ;;  %vm141_vm0 = vcmask 261120  }
   0xc   :  { %v49_v30 = vld [vmem:[%s532_s1 + $0xd0] sm:$0xff]  ;;  %v50_v31 = vld [vmem:[%s532_s1 + $0xd8] sm:$0xff]  ;;  %v303_v32 = vpack.c.bf16 %v32_v29, %v31_v28  ;;  %v51_v36 = vld [vmem:[%s532_s1 + $0xe0] sm:$0xff]  ;;  %209 = vmatprep.mubr.f32.mxu1 %v351_v62  ;;  %v220_v5 = vlaneseq }
   0xd   :  { %296 = vmatpush3.bf16.msra.mxu0 %v295_v19  ;;  %v305_v33 = vpack.c.bf16 %v50_v31, %v49_v30  ;;  %v33_v34 = vld [vmem:[%s532_s1 + $0x50] sm:$0xff]  ;;  %v34_v35 = vld [vmem:[%s532_s1 + $0x58] sm:$0xff]  ;;  %v52_v37 = vld [vmem:[%s532_s1 + $0xe8] sm:$0xff] }
   0xe   :  { %298 = vmatprep.subr.bf16.mxu0 %v297_v20  ;;  %v307_v38 = vpack.c.bf16 %v34_v35, %v33_v34  ;;  %v309_v39 = vpack.c.bf16 %v52_v37, %v51_v36  ;;  %v35_v40 = vld [vmem:[%s532_s1 + $0x60] sm:$0xff]  ;;  %v36_v41 = vld [vmem:[%s532_s1 + $0x68] sm:$0xff]  ;;  %v53_v42 = vld [vmem:[%s532_s1 + $0xf0] sm:$0xff]  ;;  %v221_v6 = vshrl.u32 %v220_v5, 7 }
   0xf   :  { %v54_v43 = vld [vmem:[%s532_s1 + $0xf8] sm:$0xff]  ;;  %v311_v44 = vpack.c.bf16 %v36_v41, %v35_v40  ;;  %v37_v46 = vld [vmem:[%s532_s1 + $0x70] sm:$0xff]  ;;  %v21_v49 = vld [vmem:[%s531_s0] sm:$0xff] }
  0x10   :  { %v313_v45 = vpack.c.bf16 %v54_v43, %v53_v42  ;;  %v38_v47 = vld [vmem:[%s532_s1 + $0x78] sm:$0xff]  ;;  %v134_v50 = vld [vmem:[%s534_s3 + $0x8] sm:$0xff]  ;;  %v133_v53 = vld [vmem:[%s534_s3] sm:$0xff]  ;;  %v222_v7 = vsub.s32 0, %v221_v6  ;;  %v226_v9 = vsub.s32 1, %v221_v6 }
  0x11   :  { %300 = vmatpush3.bf16.msra.mxu0 %v299_v26  ;;  %v315_v48 = vpack.c.bf16 %v38_v47, %v37_v46  ;;  %v136_v51 = vld [vmem:[%s534_s3 + $0x18] sm:$0xff]  ;;  %v135_v54 = vld [vmem:[%s534_s3 + $0x10] sm:$0xff]  ;;  %v138_v56 = vld [vmem:[%s534_s3 + $0x28] sm:$0xff] }
  0x12   :  { %302 = vmatprep.subr.bf16.mxu0 %v301_v27  ;;  %v317_v52 = vpack.c.bf16 %v136_v51, %v134_v50  ;;  %v319_v55 = vpack.c.bf16 %v135_v54, %v133_v53  ;;  %v140_v57 = vld [vmem:[%s534_s3 + $0x38] sm:$0xff]  ;;  %v137_v59 = vld [vmem:[%s534_s3 + $0x20] sm:$0xff]  ;;  %v139_v60 = vld [vmem:[%s534_s3 + $0x30] sm:$0xff] }
  0x13   :  { %v321_v58 = vpack.c.bf16 %v140_v57, %v138_v56  ;;  %v323_v61 = vpack.c.bf16 %v139_v60, %v137_v59  ;;  %v248_v0 = vld [vmem:[%s533_s2] ss:$0 sm:$0xff]  ;;  %s352_s2 = smov [#allocation2]  }
  0x14   :  { %318 = vmatprep.subr.bf16.mxu1 %v317_v52  ;;  %v218_v8 = vld [vmem:[%s535_s4] sm:$0x3]  ;;  %s240_s28 = sshll.u32 %s352_s2, 4  ;;  %s241_s28 = int_to_ptr.vmem [resolvable:$true] %s240_s28 }
  0x15   :  { %304 = vmatpush3.bf16.msra.mxu0 %v303_v32  ;;  %320 = vmatpush1.bf16.msra.mxu1 %v319_v55  ;;  %v223_v10 = vrot.slane %v218_v8, %v222_v7  ;;  %v227_v12 = vrot.slane %v218_v8, %v226_v9  ;;  %s327_s29 = scalar_lea.vmem %s241_s28, 256  ;;  %p332_p1 = scmp.lt.s32.totalorder %s241_s28, %s241_s28 }
  0x16   :  { %306 = vmatprep.subr.bf16.mxu0 %v305_v33  ;;  %322 = vmatprep.subr.bf16.mxu1 %v321_v58  ;;  %p328_p0 = scmp.ne.s32.totalorder %s241_s28, %s327_s29  ;;  %p333_p2 = scmp.lt.s32.totalorder %s327_s29, %s327_s29 }
  0x18   :  { %p334_p3 = por %p333_p2, %p332_p1 }
  0x19   :  { %308 = vmatpush3.bf16.msra.mxu0 %v307_v38  ;;  %324 = vmatpush1.bf16.msra.mxu1 %v323_v61 }
  0x1a   :  { %310 = vmatprep.subr.bf16.mxu0 %v309_v39  ;;  %p335_p4 = pnand %p334_p3, %p328_p0 }
  0x1d   :  { %312 = vmatpush3.bf16.msra.mxu0 %v311_v44 }
  0x1e   :  { %314 = vmatprep.subr.bf16.mxu0 %v313_v45 }
  0x21   :  { %316 = vmatpush3.bf16.msra.mxu0 %v315_v48 }
  0x24   :  { %127 = vmatmul.mubr.f32.vlgmr.msra.gmra.mrb[0].mxu0 %v21_v49 }
  0xf7   :  { %v282_v63 = vpop.f32.mrb[0].mxu0 }
  0xf8   :  { %v283_v1 = vpop.f32.mrb[1].mxu0 }
  0xf9   :  { %v284_v2 = vadd.f32 %v283_v1, %v282_v63 }
  0xfb   :  { %v129_v3 = vadd.f32 %v284_v2, %v248_v0 }
  0xfd   :  { %v132_v4 = vmax.f32 %v129_v3, 0.0 }
  0xff   :  { %249 = vmatmul.mubr.msk.f32.vlgmr.msra.gmra.mrb[0].mxu1 %vm141_vm0, %v132_v4 }
 0x1d2   :  { %v211_v11 = vpop.f32.mrb[0].mxu1 }
 0x1d3   :  { %v216_v13 = vadd.f32 %v211_v11, %v21_v49  ;;  %v213_v14 = vpop.f32.mrb[1].mxu1 }
 0x1d4   :  { %v217_v15 = vadd.f32 %v213_v14, %v440_v25 }
 0x1d5   :  { %v230_v16 = vadd.f32 %v223_v10, %v216_v13 }
 0x1d6   :  { %v231_v17 = vadd.f32 %v227_v12, %v217_v15 }
 0x1d7   :  { %232 = vst [vmem:[#allocation2] sm:$0xff] %v230_v16 }
 0x1d8   :  { %233 = vst [vmem:[#allocation2 + $0x8] sm:$0xff] %v231_v17 }
 0x1d9   :  { %338 = shalt.err (!%p335_p4)
}
 0x1da   :  { %s339_s6 = scalar_lea.hbm %s536_s5, 256 }
 0x1db   :  { %p340_p5 = scmp.ne.s32.totalorder %s536_s5, %s339_s6  ;;  %p343_p6 = scmp.lt.u32.totalorder %s339_s6, %s536_s5 }
 0x1dd   :  { %p345_p7 = pnand %p343_p6, %p340_p5 }
 0x1df   :  { %348 = shalt.err (!%p345_p7)
}
 0x1e0   :  { %243 = dma.vmem_to_hbm [thread:$0]  %s241_s28, 256, %s536_s5, [#allocation3]  }
 0x1e1   :  { %349 = dma.done.wait [#allocation3], 256  }
 0x1e2   :  { %350 = vsyncadd [#allocation3], 4294967040 }
 0x1e3   :  { %247 = vsyncpa [#allocation3], 1 }

</bundles_post_ra>
